<compile_context>
chip_gen: v5e
topology: v5e:2x2
jax: 0.10.0
libtpu: 0.0.40
codegen_flags: <defaults>
</compile_context>

<pallas_src>
import functools

import jax
import jax.numpy as jnp
from jax.experimental import pallas as pl
from jax.experimental.pallas import tpu as pltpu

X_dim = 784
Z_dim = 100
h_dim = 128

_K_PAD = 128   # Z_dim padded to a lane-aligned contraction dim
_X_PAD = 896   # 7 * 128: lane-aligned fc2 weight width (logits sliced to 784 in-kernel)


def _round_up(x, m):
    return (x + m - 1) // m * m


def _generator_kernel(z_ref, w1_ref, b1_ref, w2_ref, b2_ref, out_ref):
    # fc1 + ReLU  (MXU matmul, f32 accumulate)
    h = jnp.dot(z_ref[...], w1_ref[...], preferred_element_type=jnp.float32)
    h = jnp.maximum(h + b1_ref[...], 0.0)                 # (Bt, h) + (1, h)
    # fc2 over the lane-aligned padded width, then drop the 112 zero columns
    # BEFORE the bias / sigmoid / store so the output path stays 784 wide.
    logits = jnp.dot(h, w2_ref[...], preferred_element_type=jnp.float32)
    logits = logits[:, :X_dim] + b2_ref[...]              # (Bt, 784) + (1, 784)
    # sigmoid(x) == 0.5 * tanh(0.5 * x) + 0.5  -> one EUP transcendental/elem.
    out_ref[...] = (0.5 * jnp.tanh(0.5 * logits) + 0.5).astype(out_ref.dtype)


def prepare_generator_params(w1, b1, w2, b2):
    """One-time padding of the static weights (hoisted out of the fwd path)."""
    w1_p = jnp.zeros((_K_PAD, h_dim), jnp.float32).at[:Z_dim, :].set(w1)
    w2_p = jnp.zeros((h_dim, _X_PAD), jnp.float32).at[:, :X_dim].set(w2)
    b1_p = jnp.asarray(b1, jnp.float32).reshape(1, h_dim)
    b2_p = jnp.asarray(b2, jnp.float32).reshape(1, X_dim)
    return w1_p, b1_p, w2_p, b2_p


@functools.partial(jax.jit, static_argnames=("block_b",))
def generator_forward(z, w1_p, b1, w2_p, b2, *, block_b=512):
    """z: (B, Z_dim) f32, pre-padded params -> (B, X_dim) f32."""
    B = z.shape[0]

    # Row tile: at most block_b, 8-aligned.  For B >= 512 pick ~B/2 so the
    # "parallel" grid has >= 2 balanced steps (keeps both TensorCores busy on
    # v7x); smaller batches run as a single (possibly ragged) block.
    if B >= 512:
        block_b_eff = min(block_b, _round_up(-(-B // 2), 8))
    else:
        block_b_eff = min(block_b, _round_up(B, 8))
    grid = (pl.cdiv(B, block_b_eff),)

    # Cheap K-only pad (no batch pad): keeps the contraction lane-aligned with
    # exactly-zero padded lanes.  Ragged batch rows in the last block are
    # never written back (Pallas masks the edge-block store).
    z_p = jnp.pad(z, ((0, 0), (0, _K_PAD - Z_dim)))

    cost = pl.CostEstimate(
        flops=2 * B * (_K_PAD * h_dim + h_dim * _X_PAD),
        transcendentals=B * X_dim,
        bytes_accessed=4 * (B * _K_PAD + B * X_dim
                            + _K_PAD * h_dim + h_dim * _X_PAD
                            + h_dim + X_dim),
    )

    return pl.pallas_call(
        _generator_kernel,
        out_shape=jax.ShapeDtypeStruct((B, X_dim), jnp.float32),
        grid_spec=pltpu.PrefetchScalarGridSpec(
            num_scalar_prefetch=0,
            grid=grid,
            in_specs=[
                pl.BlockSpec((block_b_eff, _K_PAD), lambda i: (i, 0)),  # z tile
                pl.BlockSpec((_K_PAD, h_dim), lambda i: (0, 0)),        # W1 (resident)
                pl.BlockSpec((1, h_dim), lambda i: (0, 0)),             # b1
                pl.BlockSpec((h_dim, _X_PAD), lambda i: (0, 0)),        # W2 (resident)
                pl.BlockSpec((1, X_dim), lambda i: (0, 0)),             # b2
            ],
            out_specs=pl.BlockSpec((block_b_eff, X_dim), lambda i: (i, 0)),
        ),
        compiler_params=pltpu.CompilerParams(
            dimension_semantics=("parallel",),
        ),
        cost_estimate=cost,
    )(z_p, w1_p, b1, w2_p, b2)


def init_generator_params(key):
    """Deterministic init mimicking torch.nn.Linear default:
    U(-1/sqrt(fan_in), 1/sqrt(fan_in)) for both weight and bias."""
    k1, k2, k3, k4 = jax.random.split(key, 4)
    bound1 = 1.0 / jnp.sqrt(jnp.float32(Z_dim))
    bound2 = 1.0 / jnp.sqrt(jnp.float32(h_dim))
    # stored transposed: (in, out)
    w1 = jax.random.uniform(k1, (Z_dim, h_dim), jnp.float32, -bound1, bound1)
    b1 = jax.random.uniform(k2, (1, h_dim), jnp.float32, -bound1, bound1)
    w2 = jax.random.uniform(k3, (h_dim, X_dim), jnp.float32, -bound2, bound2)
    b2 = jax.random.uniform(k4, (1, X_dim), jnp.float32, -bound2, bound2)
    return w1, b1, w2, b2


def _reference(z, w1, b1, w2, b2):
    return jax.nn.sigmoid(jnp.maximum(z @ w1 + b1, 0.0) @ w2 + b2)


if __name__ == "__main__":
    key = jax.random.PRNGKey(0)
    kz, kz2, kp = jax.random.split(key, 3)
    w1, b1, w2, b2 = init_generator_params(kp)
    w1_p, b1_p, w2_p, b2_p = prepare_generator_params(w1, b1, w2, b2)

    # Small demo batch (module-consistent shape), single grid step.
    batch = 8
    z = jax.random.normal(kz, (batch, Z_dim), jnp.float32)
    out = jax.block_until_ready(generator_forward(z, w1_p, b1_p, w2_p, b2_p))
    ref = _reference(z, w1, b1, w2, b2)
    assert out.shape == (batch, X_dim)
    assert jnp.allclose(out, ref, atol=1e-5, rtol=1e-5)

    # Larger batch: 2-step "parallel" grid (both v7x TensorCores) with a
    # ragged final block (600 rows -> tiles of 304 + 296), exercising the
    # masked edge-block store.
    batch2 = 600
    z2 = jax.random.normal(kz2, (batch2, Z_dim), jnp.float32)
    out2 = jax.block_until_ready(generator_forward(z2, w1_p, b1_p, w2_p, b2_p))
    ref2 = _reference(z2, w1, b1, w2, b2)
    assert out2.shape == (batch2, X_dim)
    assert jnp.allclose(out2, ref2, atol=1e-5, rtol=1e-5)

    print("KERNEL_OK")
</pallas_src>

<mosaic_0001>
module attributes {stable_mosaic.version = 11 : i64} {
  func.func @_generator_kernel(%arg0: i32, %arg1: memref<8x128xf32, #tpu.memory_space<vmem>>, %arg2: memref<128x128xf32, #tpu.memory_space<vmem>>, %arg3: memref<1x128xf32, #tpu.memory_space<vmem>>, %arg4: memref<128x896xf32, #tpu.memory_space<vmem>>, %arg5: memref<1x784xf32, #tpu.memory_space<vmem>>, %arg6: memref<8x784xf32, #tpu.memory_space<vmem>>) attributes {dimension_semantics = [#tpu.dimension_semantics<parallel>], iteration_bounds = array<i64: 1>, scalar_prefetch = 0 : i64, scratch_operands = 0 : i64, tpu.core_type = #tpu.core_type<tc>, window_params = [{transform_indices = @transform_0, window_bounds = array<i64: 8, 128>}, {pipeline_mode = #tpu.pipeline_mode<synchronous>, transform_indices = @transform_1, window_bounds = array<i64: 128, 128>}, {pipeline_mode = #tpu.pipeline_mode<synchronous>, transform_indices = @transform_2, window_bounds = array<i64: 1, 128>}, {pipeline_mode = #tpu.pipeline_mode<synchronous>, transform_indices = @transform_3, window_bounds = array<i64: 128, 896>}, {pipeline_mode = #tpu.pipeline_mode<synchronous>, transform_indices = @transform_4, window_bounds = array<i64: 1, 784>}, {transform_indices = @transform_5, window_bounds = array<i64: 8, 784>}]} {
    %c0 = arith.constant 0 : index
    %c0_0 = arith.constant 0 : index
    %0 = vector.load %arg1[%c0, %c0_0] : memref<8x128xf32, #tpu.memory_space<vmem>>, vector<8x128xf32>
    %c0_1 = arith.constant 0 : index
    %c0_2 = arith.constant 0 : index
    %1 = vector.load %arg2[%c0_1, %c0_2] : memref<128x128xf32, #tpu.memory_space<vmem>>, vector<128x128xf32>
    %cst = arith.constant dense<0.000000e+00> : vector<8x128xf32>
    %2 = tpu.matmul %0, %1, %cst {dimension_numbers = #tpu.dot_dimension_numbers<[1], [0], [0], [1], [0, 0, 1, 1], [], []>} : vector<8x128xf32>, vector<128x128xf32>, vector<8x128xf32> -> vector<8x128xf32>
    %c0_3 = arith.constant 0 : index
    %c0_4 = arith.constant 0 : index
    %3 = vector.load %arg3[%c0_3, %c0_4] : memref<1x128xf32, #tpu.memory_space<vmem>>, vector<1x128xf32>
    %4 = vector.broadcast %3 : vector<1x128xf32> to vector<8x128xf32>
    %5 = arith.addf %2, %4 : vector<8x128xf32>
    %cst_5 = arith.constant 0.000000e+00 : f32
    %6 = vector.broadcast %cst_5 : f32 to vector<8x128xf32>
    %7 = arith.maximumf %5, %6 : vector<8x128xf32>
    %c0_6 = arith.constant 0 : index
    %c0_7 = arith.constant 0 : index
    %8 = vector.load %arg4[%c0_6, %c0_7] : memref<128x896xf32, #tpu.memory_space<vmem>>, vector<128x896xf32>
    %cst_8 = arith.constant dense<0.000000e+00> : vector<8x896xf32>
    %9 = tpu.matmul %7, %8, %cst_8 {dimension_numbers = #tpu.dot_dimension_numbers<[1], [0], [0], [1], [0, 0, 1, 1], [], []>} : vector<8x128xf32>, vector<128x896xf32>, vector<8x896xf32> -> vector<8x896xf32>
    %10 = vector.extract_strided_slice %9 {offsets = [0, 0], sizes = [8, 784], strides = [1, 1]} : vector<8x896xf32> to vector<8x784xf32>
    %c0_9 = arith.constant 0 : index
    %c0_10 = arith.constant 0 : index
    %11 = vector.load %arg5[%c0_9, %c0_10] : memref<1x784xf32, #tpu.memory_space<vmem>>, vector<1x784xf32>
    %12 = vector.broadcast %11 : vector<1x784xf32> to vector<8x784xf32>
    %13 = arith.addf %10, %12 : vector<8x784xf32>
    %cst_11 = arith.constant 5.000000e-01 : f32
    %14 = vector.broadcast %cst_11 : f32 to vector<8x784xf32>
    %15 = arith.mulf %14, %13 : vector<8x784xf32>
    %16 = math.tanh %15 : vector<8x784xf32>
    %cst_12 = arith.constant 5.000000e-01 : f32
    %17 = vector.broadcast %cst_12 : f32 to vector<8x784xf32>
    %18 = arith.mulf %17, %16 : vector<8x784xf32>
    %cst_13 = arith.constant 5.000000e-01 : f32
    %19 = vector.broadcast %cst_13 : f32 to vector<8x784xf32>
    %20 = arith.addf %18, %19 : vector<8x784xf32>
    %c0_14 = arith.constant 0 : index
    %c0_15 = arith.constant 0 : index
    %21 = vector.load %arg6[%c0_14, %c0_15] : memref<8x784xf32, #tpu.memory_space<vmem>>, vector<8x784xf32>
    tpu.vector_store %arg6[%c0_14, %c0_15], %20 {strides = array<i32>} : memref<8x784xf32, #tpu.memory_space<vmem>>, vector<8x784xf32>,
    return
  }
  func.func @transform_0(%arg0: i32) -> (i32, i32) {
    %c0_i32 = arith.constant 0 : i32
    %c0_i32_0 = arith.constant 0 : i32
    return %arg0, %c0_i32 : i32, i32
  }
  func.func @transform_1(%arg0: i32) -> (i32, i32) {
    %c0_i32 = arith.constant 0 : i32
    %c0_i32_0 = arith.constant 0 : i32
    %c0_i32_1 = arith.constant 0 : i32
    return %c0_i32, %c0_i32_0 : i32, i32
  }
  func.func @transform_2(%arg0: i32) -> (i32, i32) {
    %c0_i32 = arith.constant 0 : i32
    %c0_i32_0 = arith.constant 0 : i32
    %c0_i32_1 = arith.constant 0 : i32
    return %c0_i32, %c0_i32_0 : i32, i32
  }
  func.func @transform_3(%arg0: i32) -> (i32, i32) {
    %c0_i32 = arith.constant 0 : i32
    %c0_i32_0 = arith.constant 0 : i32
    %c0_i32_1 = arith.constant 0 : i32
    return %c0_i32, %c0_i32_0 : i32, i32
  }
  func.func @transform_4(%arg0: i32) -> (i32, i32) {
    %c0_i32 = arith.constant 0 : i32
    %c0_i32_0 = arith.constant 0 : i32
    %c0_i32_1 = arith.constant 0 : i32
    return %c0_i32, %c0_i32_0 : i32, i32
  }
  func.func @transform_5(%arg0: i32) -> (i32, i32) {
    %c0_i32 = arith.constant 0 : i32
    %c0_i32_0 = arith.constant 0 : i32
    return %arg0, %c0_i32 : i32, i32
  }
}

</mosaic_0001>

<bundles_post_ra>
// kernel: generator_forward.1
= control target key start
LH: loop header
LB: loop body
LE: loop exit
PB: predicated region body
PF: predicated region fallthrough
CT: control target
= control target key end

     0   :  { %10 = vsyncpa [#allocation3], 0  ;;  %s579_s0 = inlined_call_operand.vmem [shape: f32[8,128], index: 0, kind: input, shape index: {}]   ;;  %s580_s1 = inlined_call_operand.hbm [shape: f32[128,128], index: 1, kind: input, shape index: {}]   ;;  %s581_s2 = inlined_call_operand.vmem [shape: f32[1,128], index: 2, kind: input, shape index: {}]   ;;  %s582_s3 = inlined_call_operand.hbm [shape: f32[128,896], index: 3, kind: input, shape index: {}]   ;;  %s583_s4 = inlined_call_operand.vmem [shape: f32[1,784], index: 4, kind: input, shape index: {}]   ;;  %s584_s5 = inlined_call_operand.hbm [shape: f32[8,784], index: 5, kind: output, shape index: {}]  }
   0x1   :  { %11 = vsyncpa [#allocation6], 0 }
   0x2   :  { %12 = vsyncpa [#allocation4], 0  ;;  %s19_s20 = sshll.u32 %s580_s1, 4  ;;  %s524_s21 = smov [#allocation2]   ;;  %s20_s20 = int_to_ptr.hbm [resolvable:$true] %s19_s20 }
   0x3   :  { %s21_s22 = sshll.u32 %s524_s21, 4  ;;  %s34_s25 = sshll.u32 %s582_s3, 4  ;;  %s22_s22 = int_to_ptr.vmem [resolvable:$true] %s21_s22  ;;  %s35_s25 = int_to_ptr.hbm [resolvable:$true] %s34_s25 }
   0x4   :  { %s525_s26 = smov 128   ;;  %s526_s27 = smov 8  }
   0x5   :  { %27 = dma.hbm_to_vmem [thread:$0]  %s20_s20, 2048, %s22_s22, [#allocation3], %s525_s26, %s525_s26, %s526_s27  }
   0x6   :  { %s527_s28 = smov [#allocation5]   ;;  %s528_s30 = smov 896  }
   0x7   :  { %s36_s29 = sshll.u32 %s527_s28, 4  ;;  %s529_s6 = smov 56   ;;  %s37_s29 = int_to_ptr.vmem [resolvable:$true] %s36_s29 }
   0x8   :  { %42 = dma.hbm_to_vmem [thread:$0]  %s35_s25, 14336, %s37_s29, [#allocation6], %s528_s30, %s528_s30, %s529_s6  }
   0x9   :  { %518 = dma.done.wait [#allocation3], 2048  }
   0xa   :  { %519 = vsyncadd [#allocation3], 4294965248 }
   0xb   :  { %520 = dma.done.wait [#allocation6], 14336  }
   0xc   :  { %521 = vsyncadd [#allocation6], 4294952960  ;;  %v69_v0 = vld [vmem:[#allocation2 + $0x78] sm:$0xff]  ;;  %v68_v1 = vld [vmem:[#allocation2 + $0x70] sm:$0xff]  ;;  %s413_s12 = sshll.u32 %s584_s5, 4  ;;  %vm404_vm0 = vcmask 130048   ;;  %s414_s12 = int_to_ptr.hbm [resolvable:$true] %s413_s12 }
   0xd   :  { %74 = vmatpush.msra.mxu0 %v69_v0  ;;  %v67_v2 = vld [vmem:[#allocation2 + $0x68] sm:$0xff]  ;;  %v66_v3 = vld [vmem:[#allocation2 + $0x60] sm:$0xff]  ;;  %v65_v4 = vld [vmem:[#allocation2 + $0x58] sm:$0xff] }
   0xe   :  { %v200_v5 = vld [vmem:[#allocation5 + $0x348] sm:$0xff]  ;;  %v201_v6 = vld [vmem:[#allocation5 + $0x350] sm:$0xff]  ;;  %v202_v7 = vld [vmem:[#allocation5 + $0x358] sm:$0xff] }
   0xf   :  { %75 = vmatpush.msra.mxu0 %v68_v1  ;;  %207 = vmatpush.msra.mxu1 %v200_v5  ;;  %v193_v8 = vld [vmem:[#allocation5 + $0x310] sm:$0xff]  ;;  %v194_v9 = vld [vmem:[#allocation5 + $0x318] sm:$0xff]  ;;  %v195_v10 = vld [vmem:[#allocation5 + $0x320] sm:$0xff] }
  0x10   :  { %227 = vmatpush.msra.mxu2 %v201_v6  ;;  %v186_v11 = vld [vmem:[#allocation5 + $0x2d8] sm:$0xff]  ;;  %v64_v12 = vld [vmem:[#allocation2 + $0x50] sm:$0xff]  ;;  %247 = vmatpush.msra.mxu3 %v202_v7  ;;  %v187_v13 = vld [vmem:[#allocation5 + $0x2e0] sm:$0xff] }
  0x11   :  { %76 = vmatpush.msra.mxu0 %v67_v2  ;;  %208 = vmatpush.msra.mxu1 %v193_v8  ;;  %v188_v14 = vld [vmem:[#allocation5 + $0x2e8] sm:$0xff]  ;;  %v179_v15 = vld [vmem:[#allocation5 + $0x2a0] sm:$0xff]  ;;  %v181_v18 = vld [vmem:[#allocation5 + $0x2b0] sm:$0xff] }
  0x12   :  { %228 = vmatpush.msra.mxu2 %v194_v9  ;;  %v63_v16 = vld [vmem:[#allocation2 + $0x48] sm:$0xff]  ;;  %248 = vmatpush.msra.mxu3 %v195_v10  ;;  %v62_v20 = vld [vmem:[#allocation2 + $0x40] sm:$0xff]  ;;  %v173_v21 = vld [vmem:[#allocation5 + $0x270] sm:$0xff] }
  0x13   :  { %77 = vmatpush.msra.mxu0 %v66_v3  ;;  %209 = vmatpush.msra.mxu1 %v186_v11  ;;  %v180_v17 = vld [vmem:[#allocation5 + $0x2a8] sm:$0xff]  ;;  %v174_v22 = vld [vmem:[#allocation5 + $0x278] sm:$0xff]  ;;  %v165_v23 = vld [vmem:[#allocation5 + $0x230] sm:$0xff] }
  0x14   :  { %229 = vmatpush.msra.mxu2 %v187_v13  ;;  %v172_v19 = vld [vmem:[#allocation5 + $0x268] sm:$0xff]  ;;  %249 = vmatpush.msra.mxu3 %v188_v14  ;;  %v61_v24 = vld [vmem:[#allocation2 + $0x38] sm:$0xff]  ;;  %v167_v26 = vld [vmem:[#allocation5 + $0x240] sm:$0xff] }
  0x15   :  { %78 = vmatpush.msra.mxu0 %v65_v4  ;;  %210 = vmatpush.msra.mxu1 %v179_v15  ;;  %v166_v25 = vld [vmem:[#allocation5 + $0x238] sm:$0xff]  ;;  %v60_v28 = vld [vmem:[#allocation2 + $0x30] sm:$0xff]  ;;  %v159_v29 = vld [vmem:[#allocation5 + $0x200] sm:$0xff] }
  0x16   :  { %230 = vmatpush.msra.mxu2 %v180_v17  ;;  %250 = vmatpush.msra.mxu3 %v181_v18  ;;  %v158_v27 = vld [vmem:[#allocation5 + $0x1f8] sm:$0xff]  ;;  %v160_v30 = vld [vmem:[#allocation5 + $0x208] sm:$0xff]  ;;  %v151_v31 = vld [vmem:[#allocation5 + $0x1c0] sm:$0xff] }
  0x17   :  { %79 = vmatpush.msra.mxu0 %v64_v12  ;;  %211 = vmatpush.msra.mxu1 %v172_v19  ;;  %v59_v32 = vld [vmem:[#allocation2 + $0x28] sm:$0xff]  ;;  %v153_v34 = vld [vmem:[#allocation5 + $0x1d0] sm:$0xff]  ;;  %v58_v36 = vld [vmem:[#allocation2 + $0x20] sm:$0xff] }
  0x18   :  { %231 = vmatpush.msra.mxu2 %v173_v21  ;;  %251 = vmatpush.msra.mxu3 %v174_v22  ;;  %v152_v33 = vld [vmem:[#allocation5 + $0x1c8] sm:$0xff]  ;;  %v145_v37 = vld [vmem:[#allocation5 + $0x190] sm:$0xff]  ;;  %v146_v38 = vld [vmem:[#allocation5 + $0x198] sm:$0xff] }
  0x19   :  { %80 = vmatpush.msra.mxu0 %v63_v16  ;;  %212 = vmatpush.msra.mxu1 %v165_v23  ;;  %v144_v35 = vld [vmem:[#allocation5 + $0x188] sm:$0xff]  ;;  %v137_v39 = vld [vmem:[#allocation5 + $0x150] sm:$0xff]  ;;  %v57_v40 = vld [vmem:[#allocation2 + $0x18] sm:$0xff] }
  0x1a   :  { %232 = vmatpush.msra.mxu2 %v166_v25  ;;  %252 = vmatpush.msra.mxu3 %v167_v26  ;;  %v138_v41 = vld [vmem:[#allocation5 + $0x158] sm:$0xff]  ;;  %v139_v42 = vld [vmem:[#allocation5 + $0x160] sm:$0xff]  ;;  %v56_v44 = vld [vmem:[#allocation2 + $0x10] sm:$0xff] }
  0x1b   :  { %81 = vmatpush.msra.mxu0 %v62_v20  ;;  %213 = vmatpush.msra.mxu1 %v158_v27  ;;  %v130_v43 = vld [vmem:[#allocation5 + $0x118] sm:$0xff]  ;;  %v131_v45 = vld [vmem:[#allocation5 + $0x120] sm:$0xff]  ;;  %v132_v46 = vld [vmem:[#allocation5 + $0x128] sm:$0xff] }
  0x1c   :  { %233 = vmatpush.msra.mxu2 %v159_v29  ;;  %253 = vmatpush.msra.mxu3 %v160_v30  ;;  %v123_v47 = vld [vmem:[#allocation5 + $0xe0] sm:$0xff]  ;;  %v55_v48 = vld [vmem:[#allocation2 + $0x8] sm:$0xff]  ;;  %v125_v50 = vld [vmem:[#allocation5 + $0xf0] sm:$0xff] }
  0x1d   :  { %82 = vmatpush.msra.mxu0 %v61_v24  ;;  %214 = vmatpush.msra.mxu1 %v151_v31  ;;  %v124_v49 = vld [vmem:[#allocation5 + $0xe8] sm:$0xff]  ;;  %v54_v52 = vld [vmem:[#allocation2] sm:$0xff]  ;;  %v117_v53 = vld [vmem:[#allocation5 + $0xb0] sm:$0xff] }
  0x1e   :  { %234 = vmatpush.msra.mxu2 %v152_v33  ;;  %254 = vmatpush.msra.mxu3 %v153_v34  ;;  %v116_v51 = vld [vmem:[#allocation5 + $0xa8] sm:$0xff]  ;;  %v53_v54 = vld [vmem:[%s579_s0] sm:$0xff]  ;;  %v118_v55 = vld [vmem:[#allocation5 + $0xb8] sm:$0xff] }
  0x1f   :  { %83 = vmatpush.msra.mxu0 %v60_v28  ;;  %215 = vmatpush.msra.mxu1 %v144_v35  ;;  %v203_v56 = vld [vmem:[#allocation5 + $0x360] sm:$0xff]  ;;  %v109_v57 = vld [vmem:[#allocation5 + $0x70] sm:$0xff]  ;;  %v110_v58 = vld [vmem:[#allocation5 + $0x78] sm:$0xff] }
  0x20   :  { %235 = vmatpush.msra.mxu2 %v145_v37  ;;  %255 = vmatpush.msra.mxu3 %v146_v38  ;;  %v111_v59 = vld [vmem:[#allocation5 + $0x80] sm:$0xff]  ;;  %v196_v60 = vld [vmem:[#allocation5 + $0x328] sm:$0xff]  ;;  %v102_v61 = vld [vmem:[#allocation5 + $0x38] sm:$0xff] }
  0x21   :  { %84 = vmatpush.msra.mxu0 %v59_v32  ;;  %216 = vmatpush.msra.mxu1 %v137_v39  ;;  %v103_v62 = vld [vmem:[#allocation5 + $0x40] sm:$0xff]  ;;  %v104_v63 = vld [vmem:[#allocation5 + $0x48] sm:$0xff]  ;;  %v189_v0 = vld [vmem:[#allocation5 + $0x2f0] sm:$0xff] }
  0x22   :  { %236 = vmatpush.msra.mxu2 %v138_v41  ;;  %256 = vmatpush.msra.mxu3 %v139_v42  ;;  %v95_v1 = vld [vmem:[#allocation5] sm:$0xff]  ;;  %v96_v2 = vld [vmem:[#allocation5 + $0x8] sm:$0xff]  ;;  %v97_v3 = vld [vmem:[#allocation5 + $0x10] sm:$0xff] }
  0x23   :  { %85 = vmatpush.msra.mxu0 %v58_v36  ;;  %217 = vmatpush.msra.mxu1 %v130_v43  ;;  %v182_v4 = vld [vmem:[#allocation5 + $0x2b8] sm:$0xff]  ;;  %v204_v5 = vld [vmem:[#allocation5 + $0x368] sm:$0xff]  ;;  %v205_v6 = vld [vmem:[#allocation5 + $0x370] sm:$0xff] }
  0x24   :  { %237 = vmatpush.msra.mxu2 %v131_v45  ;;  %257 = vmatpush.msra.mxu3 %v132_v46  ;;  %v206_v7 = vld [vmem:[#allocation5 + $0x378] sm:$0xff]  ;;  %v175_v8 = vld [vmem:[#allocation5 + $0x280] sm:$0xff]  ;;  %v197_v9 = vld [vmem:[#allocation5 + $0x330] sm:$0xff] }
  0x25   :  { %86 = vmatpush.msra.mxu0 %v57_v40  ;;  %218 = vmatpush.msra.mxu1 %v123_v47  ;;  %v198_v10 = vld [vmem:[#allocation5 + $0x338] sm:$0xff]  ;;  %v199_v11 = vld [vmem:[#allocation5 + $0x340] sm:$0xff]  ;;  %v168_v12 = vld [vmem:[#allocation5 + $0x248] sm:$0xff] }
  0x26   :  { %238 = vmatpush.msra.mxu2 %v124_v49  ;;  %258 = vmatpush.msra.mxu3 %v125_v50  ;;  %v190_v13 = vld [vmem:[#allocation5 + $0x2f8] sm:$0xff]  ;;  %v191_v14 = vld [vmem:[#allocation5 + $0x300] sm:$0xff]  ;;  %v192_v15 = vld [vmem:[#allocation5 + $0x308] sm:$0xff] }
  0x27   :  { %87 = vmatpush.msra.mxu0 %v56_v44  ;;  %219 = vmatpush.msra.mxu1 %v116_v51  ;;  %v161_v16 = vld [vmem:[#allocation5 + $0x210] sm:$0xff]  ;;  %v183_v17 = vld [vmem:[#allocation5 + $0x2c0] sm:$0xff]  ;;  %v184_v18 = vld [vmem:[#allocation5 + $0x2c8] sm:$0xff] }
  0x28   :  { %239 = vmatpush.msra.mxu2 %v117_v53  ;;  %259 = vmatpush.msra.mxu3 %v118_v55  ;;  %v185_v19 = vld [vmem:[#allocation5 + $0x2d0] sm:$0xff]  ;;  %v154_v20 = vld [vmem:[#allocation5 + $0x1d8] sm:$0xff]  ;;  %v176_v21 = vld [vmem:[#allocation5 + $0x288] sm:$0xff] }
  0x29   :  { %88 = vmatpush.msra.mxu0 %v55_v48  ;;  %220 = vmatpush.msra.mxu1 %v109_v57  ;;  %v177_v22 = vld [vmem:[#allocation5 + $0x290] sm:$0xff]  ;;  %v178_v23 = vld [vmem:[#allocation5 + $0x298] sm:$0xff]  ;;  %v147_v24 = vld [vmem:[#allocation5 + $0x1a0] sm:$0xff] }
  0x2a   :  { %240 = vmatpush.msra.mxu2 %v110_v58  ;;  %260 = vmatpush.msra.mxu3 %v111_v59  ;;  %v169_v25 = vld [vmem:[#allocation5 + $0x250] sm:$0xff]  ;;  %v170_v26 = vld [vmem:[#allocation5 + $0x258] sm:$0xff]  ;;  %v171_v27 = vld [vmem:[#allocation5 + $0x260] sm:$0xff] }
  0x2b   :  { %89 = vmatpush.msra.mxu0 %v54_v52  ;;  %221 = vmatpush.msra.mxu1 %v102_v61  ;;  %v140_v28 = vld [vmem:[#allocation5 + $0x168] sm:$0xff]  ;;  %v162_v29 = vld [vmem:[#allocation5 + $0x218] sm:$0xff]  ;;  %v163_v30 = vld [vmem:[#allocation5 + $0x220] sm:$0xff] }
  0x2c   :  { %90 = vmatmul.f32.vlgmr.msra.gmra.mxu0 %v53_v54  ;;  %241 = vmatpush.msra.mxu2 %v103_v62  ;;  %v164_v31 = vld [vmem:[#allocation5 + $0x228] sm:$0xff]  ;;  %v133_v32 = vld [vmem:[#allocation5 + $0x130] sm:$0xff]  ;;  %v155_v33 = vld [vmem:[#allocation5 + $0x1e0] sm:$0xff] }
  0x2d   :  { %267 = vmatpush.msrb.mxu0 %v203_v56  ;;  %261 = vmatpush.msra.mxu3 %v104_v63  ;;  %v156_v34 = vld [vmem:[#allocation5 + $0x1e8] sm:$0xff]  ;;  %v157_v35 = vld [vmem:[#allocation5 + $0x1f0] sm:$0xff]  ;;  %v126_v36 = vld [vmem:[#allocation5 + $0xf8] sm:$0xff] }
  0x2e   :  { %222 = vmatpush.msra.mxu1 %v95_v1  ;;  %242 = vmatpush.msra.mxu2 %v96_v2  ;;  %v148_v37 = vld [vmem:[#allocation5 + $0x1a8] sm:$0xff]  ;;  %v149_v38 = vld [vmem:[#allocation5 + $0x1b0] sm:$0xff]  ;;  %v150_v39 = vld [vmem:[#allocation5 + $0x1b8] sm:$0xff] }
  0x2f   :  { %268 = vmatpush.msrb.mxu0 %v196_v60  ;;  %262 = vmatpush.msra.mxu3 %v97_v3  ;;  %v119_v40 = vld [vmem:[#allocation5 + $0xc0] sm:$0xff]  ;;  %v112_v41 = vld [vmem:[#allocation5 + $0x88] sm:$0xff]  ;;  %v141_v42 = vld [vmem:[#allocation5 + $0x170] sm:$0xff] }
  0x30   :  { %287 = vmatpush.msrb.mxu1 %v204_v5  ;;  %307 = vmatpush.msrb.mxu2 %v205_v6  ;;  %v142_v43 = vld [vmem:[#allocation5 + $0x178] sm:$0xff]  ;;  %v143_v44 = vld [vmem:[#allocation5 + $0x180] sm:$0xff]  ;;  %v105_v45 = vld [vmem:[#allocation5 + $0x50] sm:$0xff] }
  0x31   :  { %269 = vmatpush.msrb.mxu0 %v189_v0  ;;  %327 = vmatpush.msrb.mxu3 %v206_v7  ;;  %v134_v46 = vld [vmem:[#allocation5 + $0x138] sm:$0xff]  ;;  %v135_v47 = vld [vmem:[#allocation5 + $0x140] sm:$0xff]  ;;  %v136_v48 = vld [vmem:[#allocation5 + $0x148] sm:$0xff] }
  0x32   :  { %288 = vmatpush.msrb.mxu1 %v197_v9  ;;  %308 = vmatpush.msrb.mxu2 %v198_v10  ;;  %v98_v49 = vld [vmem:[#allocation5 + $0x18] sm:$0xff]  ;;  %v127_v50 = vld [vmem:[#allocation5 + $0x100] sm:$0xff]  ;;  %v128_v51 = vld [vmem:[#allocation5 + $0x108] sm:$0xff] }
  0x33   :  { %270 = vmatpush.msrb.mxu0 %v182_v4  ;;  %328 = vmatpush.msrb.mxu3 %v199_v11  ;;  %v129_v52 = vld [vmem:[#allocation5 + $0x110] sm:$0xff]  ;;  %v120_v53 = vld [vmem:[#allocation5 + $0xc8] sm:$0xff]  ;;  %v122_v55 = vld [vmem:[#allocation5 + $0xd8] sm:$0xff] }
  0x34   :  { %289 = vmatpush.msrb.mxu1 %v190_v13  ;;  %309 = vmatpush.msrb.mxu2 %v191_v14  ;;  %v121_v54 = vld [vmem:[#allocation5 + $0xd0] sm:$0xff]  ;;  %v114_v57 = vld [vmem:[#allocation5 + $0x98] sm:$0xff]  ;;  %v115_v58 = vld [vmem:[#allocation5 + $0xa0] sm:$0xff] }
  0x35   :  { %271 = vmatpush.msrb.mxu0 %v175_v8  ;;  %329 = vmatpush.msrb.mxu3 %v192_v15  ;;  %v113_v56 = vld [vmem:[#allocation5 + $0x90] sm:$0xff]  ;;  %v106_v59 = vld [vmem:[#allocation5 + $0x58] sm:$0xff]  ;;  %v107_v60 = vld [vmem:[#allocation5 + $0x60] sm:$0xff] }
  0x36   :  { %290 = vmatpush.msrb.mxu1 %v183_v17  ;;  %310 = vmatpush.msrb.mxu2 %v184_v18  ;;  %v108_v61 = vld [vmem:[#allocation5 + $0x68] sm:$0xff]  ;;  %v99_v62 = vld [vmem:[#allocation5 + $0x20] sm:$0xff]  ;;  %v101_v0 = vld [vmem:[#allocation5 + $0x30] sm:$0xff] }
  0x37   :  { %272 = vmatpush.msrb.mxu0 %v168_v12  ;;  %330 = vmatpush.msrb.mxu3 %v185_v19  ;;  %v100_v63 = vld [vmem:[#allocation5 + $0x28] sm:$0xff]  ;;  %v431_v1 = vld [vmem:[%s581_s2] ss:$0 sm:$0xff]  ;;  %s530_s2 = smov [#allocation7]  }
  0x38   :  { %291 = vmatpush.msrb.mxu1 %v176_v21  ;;  %311 = vmatpush.msrb.mxu2 %v177_v22  ;;  %v347_v5 = vld [vmem:[%s583_s4] sm:$0x7f]  ;;  %s411_s4 = sshll.u32 %s530_s2, 4  ;;  %s412_s4 = int_to_ptr.vmem [resolvable:$true] %s411_s4 }
  0x39   :  { %273 = vmatpush.msrb.mxu0 %v161_v16  ;;  %331 = vmatpush.msrb.mxu3 %v178_v23  ;;  %v349_v6 = vperm.slane %v347_v5, 0  ;;  %v352_v7 = vperm.slane %v347_v5, 3  ;;  %v350_v13 = vperm.slane %v347_v5, 1  ;;  %v351_v15 = vperm.slane %v347_v5, 2 }
  0x3a   :  { %292 = vmatpush.msrb.mxu1 %v169_v25  ;;  %312 = vmatpush.msrb.mxu2 %v170_v26  ;;  %v353_v16 = vperm.slane %v347_v5, 4 }
  0x3b   :  { %274 = vmatpush.msrb.mxu0 %v154_v20  ;;  %332 = vmatpush.msrb.mxu3 %v171_v27  ;;  %v354_v27 = vperm.slane %v347_v5, 5 }
  0x3c   :  { %293 = vmatpush.msrb.mxu1 %v162_v29  ;;  %313 = vmatpush.msrb.mxu2 %v163_v30  ;;  %v355_v30 = vperm.slane %v347_v5, 6 }
  0x3d   :  { %275 = vmatpush.msrb.mxu0 %v147_v24  ;;  %333 = vmatpush.msrb.mxu3 %v164_v31 }
  0x3e   :  { %294 = vmatpush.msrb.mxu1 %v155_v33  ;;  %314 = vmatpush.msrb.mxu2 %v156_v34 }
  0x3f   :  { %276 = vmatpush.msrb.mxu0 %v140_v28  ;;  %334 = vmatpush.msrb.mxu3 %v157_v35 }
  0x40   :  { %295 = vmatpush.msrb.mxu1 %v148_v37  ;;  %315 = vmatpush.msrb.mxu2 %v149_v38 }
  0x41   :  { %277 = vmatpush.msrb.mxu0 %v133_v32  ;;  %335 = vmatpush.msrb.mxu3 %v150_v39 }
  0x42   :  { %296 = vmatpush.msrb.mxu1 %v141_v42  ;;  %316 = vmatpush.msrb.mxu2 %v142_v43 }
  0x43   :  { %278 = vmatpush.msrb.mxu0 %v126_v36  ;;  %336 = vmatpush.msrb.mxu3 %v143_v44 }
  0x44   :  { %297 = vmatpush.msrb.mxu1 %v134_v46  ;;  %317 = vmatpush.msrb.mxu2 %v135_v47 }
  0x45   :  { %279 = vmatpush.msrb.mxu0 %v119_v40  ;;  %337 = vmatpush.msrb.mxu3 %v136_v48 }
  0x46   :  { %298 = vmatpush.msrb.mxu1 %v127_v50  ;;  %318 = vmatpush.msrb.mxu2 %v128_v51 }
  0x47   :  { %280 = vmatpush.msrb.mxu0 %v112_v41  ;;  %338 = vmatpush.msrb.mxu3 %v129_v52 }
  0x48   :  { %299 = vmatpush.msrb.mxu1 %v120_v53  ;;  %319 = vmatpush.msrb.mxu2 %v121_v54 }
  0x49   :  { %281 = vmatpush.msrb.mxu0 %v105_v45  ;;  %339 = vmatpush.msrb.mxu3 %v122_v55 }
  0x4a   :  { %300 = vmatpush.msrb.mxu1 %v113_v56  ;;  %320 = vmatpush.msrb.mxu2 %v114_v57 }
  0x4b   :  { %282 = vmatpush.msrb.mxu0 %v98_v49  ;;  %340 = vmatpush.msrb.mxu3 %v115_v58 }
  0x4c   :  { %301 = vmatpush.msrb.mxu1 %v106_v59  ;;  %321 = vmatpush.msrb.mxu2 %v107_v60 }
  0x4d   :  { %341 = vmatpush.msrb.mxu3 %v108_v61 }
  0x4e   :  { %302 = vmatpush.msrb.mxu1 %v99_v62  ;;  %322 = vmatpush.msrb.mxu2 %v100_v63 }
  0x4f   :  { %342 = vmatpush.msrb.mxu3 %v101_v0 }
  0xa9   :  { %v91_v2 = vpop.f32.mrf.mxu0 }
  0xaa   :  { %v92_v3 = vadd.f32 %v431_v1, %v91_v2 }
  0xac   :  { %v94_v4 = vmax.f32 %v92_v3, 0.0 }
  0xae   :  { %223 = vmatmul.f32.vlgmr.msra.gmra.mxu1 %v94_v4  ;;  %243 = vmatmul.f32.vlgmr.msra.gmra.mxu2 %v94_v4 }
  0xaf   :  { %263 = vmatmul.f32.vlgmr.msra.gmra.mxu3 %v94_v4  ;;  %283 = vmatmul.f32.vlgmr.msrb.gmra.mxu0 %v94_v4 }
  0xb6   :  { %303 = vmatmul.f32.vlgmr.msrb.gmra.mxu1 %v94_v4  ;;  %323 = vmatmul.f32.vlgmr.msrb.gmra.mxu2 %v94_v4 }
  0xb7   :  { %343 = vmatmul.f32.vlgmr.msrb.gmra.mxu3 %v94_v4 }
 0x12b   :  { %v224_v8 = vpop.f32.mrf.mxu1 }
 0x12c   :  { %v363_v9 = vadd.f32 %v349_v6, %v224_v8  ;;  %v284_v10 = vpop.f32.mrf.mxu0 }
 0x12d   :  { %v366_v11 = vadd.f32 %v352_v7, %v284_v10 }
 0x12e   :  { %v370_v12 = vmul.f32 0.5, %v363_v9 }
 0x12f   :  { %v373_v14 = vmul.f32 0.5, %v366_v11 }
 0x130   :  { %432 = vtanh.f32 %v370_v12 }
 0x131   :  { %434 = vtanh.f32 %v373_v14  ;;  %v244_v17 = vpop.f32.mrf.mxu2 }
 0x132   :  { %v364_v18 = vadd.f32 %v350_v13, %v244_v17  ;;  %v264_v19 = vpop.f32.mrf.mxu3 }
 0x133   :  { %v365_v20 = vadd.f32 %v351_v15, %v264_v19  ;;  %v304_v21 = vpop.f32.mrf.mxu1 }
 0x134   :  { %v371_v22 = vmul.f32 0.5, %v364_v18  ;;  %v367_v23 = vadd.f32 %v353_v16, %v304_v21 }
 0x135   :  { %v372_v24 = vmul.f32 0.5, %v365_v20 }
 0x136   :  { %v433_v25 = vpop.eup %432  ;;  %436 = vtanh.f32 %v371_v22  ;;  %v374_v26 = vmul.f32 0.5, %v367_v23 }
 0x137   :  { %v435_v28 = vpop.eup %434  ;;  %v384_v29 = vmul.f32 0.5, %v433_v25  ;;  %438 = vtanh.f32 %v372_v24 }
 0x138   :  { %v387_v31 = vmul.f32 0.5, %v435_v28  ;;  %440 = vtanh.f32 %v374_v26 }
 0x139   :  { %v391_v32 = vadd.f32 0.5, %v384_v29  ;;  %v324_v33 = vpop.f32.mrf.mxu2 }
 0x13a   :  { %v394_v34 = vadd.f32 0.5, %v387_v31  ;;  %v368_v35 = vadd.f32 %v354_v27, %v324_v33  ;;  %v344_v36 = vpop.f32.mrf.mxu3 }
 0x13b   :  { %398 = vst [vmem:[#allocation7] sm:$0xff] %v391_v32  ;;  %v369_v37 = vadd.f32 %v355_v30, %v344_v36 }
 0x13c   :  { %v437_v38 = vpop.eup %436  ;;  %401 = vst [vmem:[#allocation7 + $0x18] sm:$0xff] %v394_v34  ;;  %v375_v39 = vmul.f32 0.5, %v368_v35 }
 0x13d   :  { %v439_v40 = vpop.eup %438  ;;  %v385_v41 = vmul.f32 0.5, %v437_v38  ;;  %v376_v42 = vmul.f32 0.5, %v369_v37 }
 0x13e   :  { %v441_v43 = vpop.eup %440  ;;  %v386_v44 = vmul.f32 0.5, %v439_v40  ;;  %442 = vtanh.f32 %v375_v39 }
 0x13f   :  { %v392_v45 = vadd.f32 0.5, %v385_v41  ;;  %v388_v46 = vmul.f32 0.5, %v441_v43  ;;  %444 = vtanh.f32 %v376_v42 }
 0x140   :  { %v393_v47 = vadd.f32 0.5, %v386_v44 }
 0x141   :  { %399 = vst [vmem:[#allocation7 + $0x8] sm:$0xff] %v392_v45  ;;  %v395_v48 = vadd.f32 0.5, %v388_v46 }
 0x142   :  { %400 = vst [vmem:[#allocation7 + $0x10] sm:$0xff] %v393_v47 }
 0x143   :  { %402 = vst [vmem:[#allocation7 + $0x20] sm:$0xff] %v395_v48 }
 0x144   :  { %v443_v49 = vpop.eup %442 }
 0x145   :  { %v445_v50 = vpop.eup %444  ;;  %v389_v51 = vmul.f32 0.5, %v443_v49 }
 0x146   :  { %v390_v52 = vmul.f32 0.5, %v445_v50 }
 0x147   :  { %v396_v53 = vadd.f32 0.5, %v389_v51 }
 0x148   :  { %v397_v54 = vadd.f32 0.5, %v390_v52 }
 0x149   :  { %403 = vst [vmem:[#allocation7 + $0x28] sm:$0xff] %v396_v53 }
 0x14a   :  { %405 = vst.msk [vmem:[#allocation7 + $0x30] sm:$0xff] %vm404_vm0, %v397_v54 }
 0x14b   :  { %416 = dma.vmem_to_hbm [thread:$0]  %s412_s4, 896, %s414_s12, [#allocation4]  }
 0x14c   :  { %522 = dma.done.wait [#allocation4], 896  }
 0x14d   :  { %523 = vsyncadd [#allocation4], 4294966400 }
 0x14e   :  { %421 = vsyncpa [#allocation3], 1 }
 0x14f   :  { %422 = vsyncpa [#allocation6], 1 }
 0x150   :  { %423 = vsyncpa [#allocation4], 1 }

</bundles_post_ra>
